<compile_context>
chip_gen: v7x
topology: tpu7x:2x2x1
jax: 0.10.0
libtpu: 0.0.40
codegen_flags: <defaults>
</compile_context>

<pallas_src>
import jax
import jax.numpy as jnp
from jax.experimental import pallas as pl
from jax.experimental.pallas import tpu as pltpu

LANE = 128
SUBLANE = 8
BN_EPS = 1e-5


def _round_up(n, m):
    return ((n + m - 1) // m) * m


def _full_spec(shape):
    # Small problem: every operand is a single full-array block resident in VMEM.
    return pl.BlockSpec(shape, lambda: tuple(0 for _ in shape))


# ---------------- Fused Pallas kernel ----------------

def _make_fused_mlp_kernel(layout):
    """kernel(x_ref, params_ref, o_ref) over a single packed parameter slab.

    Slab rows: [W0 block | W1 block | ... | W_final block |
                gamma_0, beta_0, gamma_1, beta_1, ..., final_bias]
    """
    num_hidden = layout["num_hidden"]
    width = layout["width"]            # padded feature width (multiple of 128)
    noutput = layout["noutput"]
    w_offs = layout["weight_offsets"]  # static row offsets (8-aligned)
    w_fins = layout["weight_fins"]     # rows actually used per weight block
    v_off = layout["vec_offset"]       # row offset of gamma/beta/bias rows

    def kernel(x_ref, p_ref, o_ref):
        x = x_ref[...]                                   # (B, ninput) f32
        inv_b = 1.0 / x.shape[0]

        for l in range(num_hidden):
            w = p_ref[pl.ds(w_offs[l], w_fins[l]), :]    # (fin, width)
            # Hidden Linear bias omitted: exactly cancelled by BN mean subtraction.
            y = jnp.dot(x, w, preferred_element_type=jnp.float32)   # (B, width)

            # One-pass train-mode BatchNorm1d stats (biased variance), all f32.
            mean = jnp.sum(y, axis=0, keepdims=True) * inv_b
            mean_sq = jnp.sum(y * y, axis=0, keepdims=True) * inv_b
            var = mean_sq - mean * mean

            gamma = p_ref[pl.ds(v_off + 2 * l, 1), :]    # (1, width)
            beta = p_ref[pl.ds(v_off + 2 * l + 1, 1), :]

            # Folded BN: single FMA per element (rsqrt runs on the EUP).
            scale = gamma * jax.lax.rsqrt(var + BN_EPS)
            shift = beta - mean * scale
            x = jnp.maximum(y * scale + shift, 0.0)       # ReLU, (B, width)

        # Final Linear (keeps its bias).
        w = p_ref[pl.ds(w_offs[num_hidden], w_fins[num_hidden]), :]
        b = p_ref[pl.ds(v_off + 2 * num_hidden, 1), :]
        res = jnp.dot(x, w, preferred_element_type=jnp.float32) + b  # (B, width)
        if noutput < width:
            res = res[:, :noutput]
        o_ref[...] = res

    return kernel


# ---------------- Parameter setup (plain JAX glue) ----------------

def init_mlp_g_params(key, ninput, noutput, layers_str, init_std=0.02):
    """Unpadded params, mirroring PyTorch MLP_G.init_weights()."""
    layer_sizes = [ninput] + [int(s) for s in layers_str.split("-")]
    hidden = []
    for i in range(len(layer_sizes) - 1):
        fin, fout = layer_sizes[i], layer_sizes[i + 1]
        key, kw, kg = jax.random.split(key, 3)
        # PyTorch Linear weight is (out, in); y = x @ W.T + b. We store W.T.
        w_t = (jax.random.normal(kw, (fout, fin), jnp.float32) * init_std).T
        b = jnp.zeros((fout,), jnp.float32)
        gamma = jax.random.normal(kg, (fout,), jnp.float32) * init_std
        beta = jnp.zeros((fout,), jnp.float32)
        hidden.append((w_t, b, gamma, beta))
    fin, fout = layer_sizes[-1], noutput
    key, kw = jax.random.split(key)
    w_t = (jax.random.normal(kw, (fout, fin), jnp.float32) * init_std).T
    b = jnp.zeros((fout,), jnp.float32)
    return {"hidden": hidden, "final": (w_t, b)}


def pack_mlp_g_params(params):
    """Pack every weight and all per-layer vectors into one lane-dense
    (rows, width) f32 slab so the fused kernel needs a single parameter DMA.

    * fout of every layer is zero-padded to `width` (multiple of 128 lanes);
      gamma/beta are zero in padded lanes, keeping padded activations exactly 0.
    * fin of layer 0 stays at ninput (x is passed unpadded); fin of later
      layers is `width` (activations are width-wide with zero padded lanes).
    """
    hidden = params["hidden"]
    w_f, b_f = params["final"]
    num_hidden = len(hidden)
    ninput = hidden[0][0].shape[0] if num_hidden else w_f.shape[0]
    noutput = w_f.shape[1]

    fouts = [w.shape[1] for (w, _b, _g, _bt) in hidden] + [noutput]
    width = max(_round_up(f, LANE) for f in fouts)

    all_weights = [w for (w, _b, _g, _bt) in hidden] + [w_f]
    blocks, w_offs, w_fins = [], [], []
    row = 0
    for l, w in enumerate(all_weights):
        fin, fout = w.shape
        in_rows = fin if l == 0 else width           # rows the kernel will use
        blk = jnp.pad(w.astype(jnp.float32),
                      ((0, in_rows - fin), (0, width - fout)))
        reserved = _round_up(in_rows, SUBLANE)       # keep offsets 8-aligned
        blk = jnp.pad(blk, ((0, reserved - in_rows), (0, 0)))
        blocks.append(blk)
        w_offs.append(row)
        w_fins.append(in_rows)
        row += reserved

    v_off = row
    vec_rows = []
    for (_w, _b, gamma, beta) in hidden:
        vec_rows.append(jnp.pad(gamma.astype(jnp.float32), (0, width - gamma.shape[0])))
        vec_rows.append(jnp.pad(beta.astype(jnp.float32), (0, width - beta.shape[0])))
    vec_rows.append(jnp.pad(b_f.astype(jnp.float32), (0, width - b_f.shape[0])))
    blocks.append(jnp.stack(vec_rows, axis=0))
    row += len(vec_rows)

    total_rows = _round_up(row, SUBLANE)
    slab = jnp.concatenate(blocks, axis=0)
    slab = jnp.pad(slab, ((0, total_rows - slab.shape[0]), (0, 0)))

    layout = {
        "num_hidden": num_hidden,
        "width": width,
        "ninput": ninput,
        "noutput": noutput,
        "weight_offsets": tuple(w_offs),
        "weight_fins": tuple(w_fins),
        "vec_offset": v_off,
    }
    return {"slab": slab, "layout": layout}


# ---------------- Fused forward (single pallas_call, no wrapper HLOs) ----------------

def mlp_g_forward_pallas(packed, x):
    slab = packed["slab"]
    layout = packed["layout"]
    B = x.shape[0]
    num_hidden = layout["num_hidden"]
    width = layout["width"]
    noutput = layout["noutput"]
    assert x.shape[1] == layout["ninput"], "input feature dim mismatch"

    kernel = _make_fused_mlp_kernel(layout)

    flops = int(2 * B * sum(fin * width for fin in layout["weight_fins"]))
    transcendentals = int(num_hidden * width)             # rsqrt per hidden feature
    bytes_accessed = int(4 * (x.size + slab.size + B * noutput))

    # Right-size scoped VMEM: actual footprint (inputs + output + live
    # activations) with generous headroom, clamped to the physical cap.
    footprint = 4 * (x.size + slab.size + B * noutput + B * width * (num_hidden + 2))
    vmem_limit = int(min(64 * 1024 * 1024, max(4 * 1024 * 1024, 8 * footprint)))

    return pl.pallas_call(
        kernel,
        out_shape=jax.ShapeDtypeStruct((B, noutput), jnp.float32),
        in_specs=[_full_spec(x.shape), _full_spec(slab.shape)],
        out_specs=_full_spec((B, noutput)),
        cost_estimate=pl.CostEstimate(
            flops=flops,
            transcendentals=transcendentals,
            bytes_accessed=bytes_accessed,
        ),
        compiler_params=pltpu.CompilerParams(vmem_limit_bytes=vmem_limit),
    )(x, slab)


# ---------------- Pure-JAX reference (for sanity check) ----------------

def mlp_g_reference(params, x):
    hi = jax.lax.Precision.HIGHEST
    for (w, b, gamma, beta) in params["hidden"]:
        y = jnp.dot(x, w, precision=hi) + b
        mean = jnp.mean(y, axis=0, keepdims=True)
        var = jnp.mean((y - mean) ** 2, axis=0, keepdims=True)
        y = gamma * (y - mean) * jax.lax.rsqrt(var + BN_EPS) + beta
        x = jnp.maximum(y, 0.0)
    w, b = params["final"]
    return jnp.dot(x, w, precision=hi) + b


if __name__ == "__main__":
    key = jax.random.PRNGKey(0)
    kp, kx = jax.random.split(key)

    ninput, noutput, layers_str = 32, 32, "64-64"
    batch = 8

    params = init_mlp_g_params(kp, ninput, noutput, layers_str)
    packed = pack_mlp_g_params(params)
    x = jax.random.normal(kx, (batch, ninput), jnp.float32)

    out = jax.block_until_ready(mlp_g_forward_pallas(packed, x))
    ref = mlp_g_reference(params, x)

    assert out.shape == (batch, noutput)
    assert jnp.allclose(out, ref, atol=1e-4, rtol=1e-3), "mismatch vs reference"

    print("KERNEL_OK")
</pallas_src>

<mosaic_0001>
module attributes {stable_mosaic.version = 11 : i64} {
  func.func @kernel(%arg0: memref<8x32xf32, #tpu.memory_space<vmem>>, %arg1: memref<296x128xf32, #tpu.memory_space<vmem>>, %arg2: memref<8x32xf32, #tpu.memory_space<vmem>>) attributes {dimension_semantics = [], scalar_prefetch = 0 : i64, scratch_operands = 0 : i64, tpu.core_type = #tpu.core_type<tc>} {
    %c0 = arith.constant 0 : index
    %c0_0 = arith.constant 0 : index
    %0 = vector.load %arg0[%c0, %c0_0] : memref<8x32xf32, #tpu.memory_space<vmem>>, vector<8x32xf32>
    %c0_1 = arith.constant 0 : index
    %c0_2 = arith.constant 0 : index
    %1 = vector.load %arg1[%c0_1, %c0_2] : memref<296x128xf32, #tpu.memory_space<vmem>>, vector<32x128xf32>
    %cst = arith.constant dense<0.000000e+00> : vector<8x128xf32>
    %2 = tpu.matmul %0, %1, %cst {dimension_numbers = #tpu.dot_dimension_numbers<[1], [0], [0], [1], [0, 0, 1, 1], [], []>} : vector<8x32xf32>, vector<32x128xf32>, vector<8x128xf32> -> vector<8x128xf32>
    %cst_3 = arith.constant dense<0.000000e+00> : vector<128xf32>
    %3 = vector.multi_reduction <add>, %2, %cst_3 [0] : vector<8x128xf32> to vector<128xf32>
    %4 = vector.shape_cast %3 : vector<128xf32> to vector<1x128xf32>
    %cst_4 = arith.constant 1.250000e-01 : f32
    %5 = vector.broadcast %cst_4 : f32 to vector<1x128xf32>
    %6 = arith.mulf %4, %5 : vector<1x128xf32>
    %7 = arith.mulf %2, %2 : vector<8x128xf32>
    %cst_5 = arith.constant dense<0.000000e+00> : vector<128xf32>
    %8 = vector.multi_reduction <add>, %7, %cst_5 [0] : vector<8x128xf32> to vector<128xf32>
    %9 = vector.shape_cast %8 : vector<128xf32> to vector<1x128xf32>
    %cst_6 = arith.constant 1.250000e-01 : f32
    %10 = vector.broadcast %cst_6 : f32 to vector<1x128xf32>
    %11 = arith.mulf %9, %10 : vector<1x128xf32>
    %12 = arith.mulf %6, %6 : vector<1x128xf32>
    %13 = arith.subf %11, %12 : vector<1x128xf32>
    %c288 = arith.constant 288 : index
    %c0_7 = arith.constant 0 : index
    %14 = vector.load %arg1[%c288, %c0_7] : memref<296x128xf32, #tpu.memory_space<vmem>>, vector<1x128xf32>
    %c289 = arith.constant 289 : index
    %c0_8 = arith.constant 0 : index
    %15 = vector.load %arg1[%c289, %c0_8] : memref<296x128xf32, #tpu.memory_space<vmem>>, vector<1x128xf32>
    %cst_9 = arith.constant 9.99999974E-6 : f32
    %16 = vector.broadcast %cst_9 : f32 to vector<1x128xf32>
    %17 = arith.addf %13, %16 : vector<1x128xf32>
    %18 = math.rsqrt %17 : vector<1x128xf32>
    %19 = arith.mulf %14, %18 : vector<1x128xf32>
    %20 = arith.mulf %6, %19 : vector<1x128xf32>
    %21 = arith.subf %15, %20 : vector<1x128xf32>
    %22 = vector.broadcast %19 : vector<1x128xf32> to vector<8x128xf32>
    %23 = arith.mulf %2, %22 : vector<8x128xf32>
    %24 = vector.broadcast %21 : vector<1x128xf32> to vector<8x128xf32>
    %25 = arith.addf %23, %24 : vector<8x128xf32>
    %cst_10 = arith.constant 0.000000e+00 : f32
    %26 = vector.broadcast %cst_10 : f32 to vector<8x128xf32>
    %27 = arith.maximumf %25, %26 : vector<8x128xf32>
    %c32 = arith.constant 32 : index
    %c0_11 = arith.constant 0 : index
    %28 = vector.load %arg1[%c32, %c0_11] : memref<296x128xf32, #tpu.memory_space<vmem>>, vector<128x128xf32>
    %cst_12 = arith.constant dense<0.000000e+00> : vector<8x128xf32>
    %29 = tpu.matmul %27, %28, %cst_12 {dimension_numbers = #tpu.dot_dimension_numbers<[1], [0], [0], [1], [0, 0, 1, 1], [], []>} : vector<8x128xf32>, vector<128x128xf32>, vector<8x128xf32> -> vector<8x128xf32>
    %cst_13 = arith.constant dense<0.000000e+00> : vector<128xf32>
    %30 = vector.multi_reduction <add>, %29, %cst_13 [0] : vector<8x128xf32> to vector<128xf32>
    %31 = vector.shape_cast %30 : vector<128xf32> to vector<1x128xf32>
    %cst_14 = arith.constant 1.250000e-01 : f32
    %32 = vector.broadcast %cst_14 : f32 to vector<1x128xf32>
    %33 = arith.mulf %31, %32 : vector<1x128xf32>
    %34 = arith.mulf %29, %29 : vector<8x128xf32>
    %cst_15 = arith.constant dense<0.000000e+00> : vector<128xf32>
    %35 = vector.multi_reduction <add>, %34, %cst_15 [0] : vector<8x128xf32> to vector<128xf32>
    %36 = vector.shape_cast %35 : vector<128xf32> to vector<1x128xf32>
    %cst_16 = arith.constant 1.250000e-01 : f32
    %37 = vector.broadcast %cst_16 : f32 to vector<1x128xf32>
    %38 = arith.mulf %36, %37 : vector<1x128xf32>
    %39 = arith.mulf %33, %33 : vector<1x128xf32>
    %40 = arith.subf %38, %39 : vector<1x128xf32>
    %c290 = arith.constant 290 : index
    %c0_17 = arith.constant 0 : index
    %41 = vector.load %arg1[%c290, %c0_17] : memref<296x128xf32, #tpu.memory_space<vmem>>, vector<1x128xf32>
    %c291 = arith.constant 291 : index
    %c0_18 = arith.constant 0 : index
    %42 = vector.load %arg1[%c291, %c0_18] : memref<296x128xf32, #tpu.memory_space<vmem>>, vector<1x128xf32>
    %cst_19 = arith.constant 9.99999974E-6 : f32
    %43 = vector.broadcast %cst_19 : f32 to vector<1x128xf32>
    %44 = arith.addf %40, %43 : vector<1x128xf32>
    %45 = math.rsqrt %44 : vector<1x128xf32>
    %46 = arith.mulf %41, %45 : vector<1x128xf32>
    %47 = arith.mulf %33, %46 : vector<1x128xf32>
    %48 = arith.subf %42, %47 : vector<1x128xf32>
    %49 = vector.broadcast %46 : vector<1x128xf32> to vector<8x128xf32>
    %50 = arith.mulf %29, %49 : vector<8x128xf32>
    %51 = vector.broadcast %48 : vector<1x128xf32> to vector<8x128xf32>
    %52 = arith.addf %50, %51 : vector<8x128xf32>
    %cst_20 = arith.constant 0.000000e+00 : f32
    %53 = vector.broadcast %cst_20 : f32 to vector<8x128xf32>
    %54 = arith.maximumf %52, %53 : vector<8x128xf32>
    %c160 = arith.constant 160 : index
    %c0_21 = arith.constant 0 : index
    %55 = vector.load %arg1[%c160, %c0_21] : memref<296x128xf32, #tpu.memory_space<vmem>>, vector<128x128xf32>
    %c292 = arith.constant 292 : index
    %c0_22 = arith.constant 0 : index
    %56 = vector.load %arg1[%c292, %c0_22] : memref<296x128xf32, #tpu.memory_space<vmem>>, vector<1x128xf32>
    %cst_23 = arith.constant dense<0.000000e+00> : vector<8x128xf32>
    %57 = tpu.matmul %54, %55, %cst_23 {dimension_numbers = #tpu.dot_dimension_numbers<[1], [0], [0], [1], [0, 0, 1, 1], [], []>} : vector<8x128xf32>, vector<128x128xf32>, vector<8x128xf32> -> vector<8x128xf32>
    %58 = vector.broadcast %56 : vector<1x128xf32> to vector<8x128xf32>
    %59 = arith.addf %57, %58 : vector<8x128xf32>
    %60 = vector.extract_strided_slice %59 {offsets = [0, 0], sizes = [8, 32], strides = [1, 1]} : vector<8x128xf32> to vector<8x32xf32>
    %c0_24 = arith.constant 0 : index
    %c0_25 = arith.constant 0 : index
    %61 = vector.load %arg2[%c0_24, %c0_25] : memref<8x32xf32, #tpu.memory_space<vmem>>, vector<8x32xf32>
    tpu.vector_store %arg2[%c0_24, %c0_25], %60 {strides = array<i32>} : memref<8x32xf32, #tpu.memory_space<vmem>>, vector<8x32xf32>,
    return
  }
}

</mosaic_0001>

<bundles_post_ra>
// kernel: tpu_custom_call.1
= control target key start
LH: loop header
LB: loop body
LE: loop exit
PB: predicated region body
PF: predicated region fallthrough
CT: control target
= control target key end

     0   :  { %7 = vsyncpa [#allocation3], 0  ;;  %s736_s0 = inlined_call_operand.hbm [shape: f32[8,32], index: 0, kind: input, shape index: {}]   ;;  %s737_s1 = inlined_call_operand.hbm [shape: f32[296,128], index: 1, kind: input, shape index: {}]   ;;  %s738_s2 = inlined_call_operand.hbm [shape: f32[8,32], index: 2, kind: output, shape index: {}]  }
   0x1   :  { %8 = vsyncpa [#allocation6], 0 }
   0x2   :  { %9 = vsyncpa [#allocation4], 0  ;;  %s641_s9 = smov [#allocation2]   ;;  %s642_s11 = smov [#allocation5]  }
   0x3   :  { %s16_s10 = sshll.u32 %s641_s9, 4  ;;  %s25_s12 = sshll.u32 %s642_s11, 4  ;;  %s17_s10 = int_to_ptr.vmem [resolvable:$true] %s16_s10  ;;  %s664_s12 = int_to_ptr.vmem [resolvable:$true] %s25_s12 }
   0x4   :  { %s569_s15 = scalar_lea.hbm %s736_s0, 128 }
   0x5   :  { %p570_p0 = scmp.ne.s32.totalorder %s736_s0, %s569_s15  ;;  %p573_p1 = scmp.lt.u32.totalorder %s569_s15, %s736_s0 }
   0x7   :  { %p575_p2 = pnand %p573_p1, %p570_p0 }
   0x9   :  { %578 = shalt.err (!%p575_p2)
}
   0xa   :  { %s579_s20 = scalar_lea.vmem %s17_s10, 128  ;;  %p584_p4 = scmp.lt.s32.totalorder %s17_s10, %s17_s10 }
   0xb   :  { %p580_p3 = scmp.ne.s32.totalorder %s17_s10, %s579_s20  ;;  %p585_p5 = scmp.lt.s32.totalorder %s579_s20, %s579_s20 }
   0xd   :  { %p586_p6 = por %p585_p5, %p584_p4 }
   0xf   :  { %p587_p7 = pnand %p586_p6, %p580_p3 }
  0x11   :  { %590 = shalt.err (!%p587_p7)
}
  0x12   :  { %19 = dma.hbm_to_vmem [thread:$0]  %s736_s0, 128, %s17_s10, [#allocation3]  }
  0x13   :  { %s591_s25 = scalar_lea.hbm %s737_s1, 4736 }
  0x14   :  { %p592_p8 = scmp.ne.s32.totalorder %s737_s1, %s591_s25  ;;  %p595_p9 = scmp.lt.u32.totalorder %s591_s25, %s737_s1 }
  0x16   :  { %p597_p10 = pnand %p595_p9, %p592_p8 }
  0x18   :  { %600 = shalt.err (!%p597_p10)
}
  0x19   :  { %s601_s30 = scalar_lea.vmem %s664_s12, 4736  ;;  %p606_p12 = scmp.lt.s32.totalorder %s664_s12, %s664_s12 }
  0x1a   :  { %p602_p11 = scmp.ne.s32.totalorder %s664_s12, %s601_s30  ;;  %p607_p13 = scmp.lt.s32.totalorder %s601_s30, %s601_s30 }
  0x1c   :  { %p608_p0 = por %p607_p13, %p606_p12 }
  0x1e   :  { %p609_p1 = pnand %p608_p0, %p602_p11 }
  0x20   :  { %612 = shalt.err (!%p609_p1)
}
  0x21   :  { %s643_s0 = smov 128   ;;  %s644_s3 = smov 8  }
  0x22   :  { %31 = dma.hbm_to_vmem [thread:$0]  %s737_s1, 4736, %s664_s12, [#allocation6], %s643_s0, %s643_s0, %s644_s3  }
  0x23   :  { %635 = dma.done.wait [#allocation3], 128  }
  0x24   :  { %636 = vsyncadd [#allocation3], 4294967168 }
  0x25   :  { %637 = dma.done.wait [#allocation6], 4736  }
  0x26   :  { %638 = vsyncadd [#allocation6], 4294962560  ;;  %v645_v0 = vmov 0.0|0.0   ;;  %vm646_vm0 = vmmov 0   ;;  %v647_v1 = vmov 0.0   ;;  %v39_v2 = vld [vmem:[#allocation5] sm:$0xff]  ;;  %v141_v53 = vlaneseq }
  0x27   :  { %503 = vmatprep.subr.bf16.mxu0 %v645_v0  ;;  %430 = vmatprep.mubr.msk.f32.mxu0 %vm646_vm0, %v647_v1  ;;  %v40_v3 = vld [vmem:[#allocation5 + $0x8] sm:$0xff]  ;;  %v41_v4 = vld [vmem:[#allocation5 + $0x10] sm:$0xff]  ;;  %v42_v6 = vld [vmem:[#allocation5 + $0x18] sm:$0xff]  ;;  %vm43_vm1 = vcmask 261120   ;;  %s648_s1 = smov [#allocation7]  }
  0x28   :  { %509 = vmatprep.subr.bf16.mxu1 %v645_v0  ;;  %465 = vmatprep.mubr.msk.f32.mxu1 %vm646_vm0, %v647_v1  ;;  %v504_v5 = vpack.c.bf16 %v40_v3, %v39_v2  ;;  %v507_v7 = vpack.c.bf16 %v42_v6, %v41_v4  ;;  %v38_v8 = vld [vmem:[#allocation2] sm:$0xff]  ;;  %v152_v9 = vld [vmem:[#allocation5 + $0x20] sm:$0xff]  ;;  %v153_v10 = vld [vmem:[#allocation5 + $0x28] sm:$0xff]  ;;  %v142_v54 = vshrl.u32 %v141_v53, 7  ;;  %s371_s6 = sshll.u32 %s648_s1, 4  ;;  %s372_s6 = int_to_ptr.vmem [resolvable:$true] %s371_s6 }
  0x29   :  { %v510_v11 = vpack.c.bf16 %v153_v10, %v152_v9  ;;  %v154_v12 = vld [vmem:[#allocation5 + $0x30] sm:$0xff]  ;;  %v155_v13 = vld [vmem:[#allocation5 + $0x38] sm:$0xff]  ;;  %v156_v15 = vld [vmem:[#allocation5 + $0x40] sm:$0xff]  ;;  %s613_s7 = scalar_lea.vmem %s372_s6, 128  ;;  %p618_p3 = scmp.lt.s32.totalorder %s372_s6, %s372_s6 }
  0x2a   :  { %505 = vmatpush3.bf16.msra.mxu0 %v504_v5  ;;  %v513_v14 = vpack.c.bf16 %v155_v13, %v154_v12  ;;  %v157_v16 = vld [vmem:[#allocation5 + $0x48] sm:$0xff]  ;;  %v158_v18 = vld [vmem:[#allocation5 + $0x50] sm:$0xff]  ;;  %v159_v19 = vld [vmem:[#allocation5 + $0x58] sm:$0xff]  ;;  %v710_v56 = vsub.s32 0, %v142_v54  ;;  %p614_p2 = scmp.ne.s32.totalorder %s372_s6, %s613_s7  ;;  %p619_p4 = scmp.lt.s32.totalorder %s613_s7, %s613_s7 }
  0x2b   :  { %506 = vmatprep.subr.bf16.mxu0 %v645_v0  ;;  %511 = vmatpush3.bf16.msra.mxu1 %v510_v11  ;;  %v516_v17 = vpack.c.bf16 %v157_v16, %v156_v15  ;;  %v519_v20 = vpack.c.bf16 %v159_v19, %v158_v18  ;;  %v160_v21 = vld [vmem:[#allocation5 + $0x60] sm:$0xff]  ;;  %v161_v22 = vld [vmem:[#allocation5 + $0x68] sm:$0xff]  ;;  %v162_v24 = vld [vmem:[#allocation5 + $0x70] sm:$0xff] }
  0x2c   :  { %512 = vmatprep.subr.bf16.mxu1 %v645_v0  ;;  %v522_v23 = vpack.c.bf16 %v161_v22, %v160_v21  ;;  %v163_v25 = vld [vmem:[#allocation5 + $0x78] sm:$0xff]  ;;  %v164_v27 = vld [vmem:[#allocation5 + $0x80] sm:$0xff]  ;;  %v165_v28 = vld [vmem:[#allocation5 + $0x88] sm:$0xff]  ;;  %p620_p5 = por %p619_p4, %p618_p3 }
  0x2d   :  { %v525_v26 = vpack.c.bf16 %v163_v25, %v162_v24  ;;  %v528_v29 = vpack.c.bf16 %v165_v28, %v164_v27  ;;  %v166_v30 = vld [vmem:[#allocation5 + $0x90] sm:$0xff]  ;;  %v167_v31 = vld [vmem:[#allocation5 + $0x98] sm:$0xff]  ;;  %v134_v55 = vld [vmem:[#allocation5 + $0x120] sm:$0x1] }
  0x2e   :  { %508 = vmatpush3.bf16.msra.mxu0 %v507_v7  ;;  %v531_v32 = vpack.c.bf16 %v167_v31, %v166_v30  ;;  %v135_v59 = vld [vmem:[#allocation5 + $0x121] sm:$0x1]  ;;  %v274_v5 = vld [vmem:[#allocation5 + $0xa8] sm:$0xff]  ;;  %v275_v7 = vld [vmem:[#allocation5 + $0xb0] sm:$0xff]  ;;  %p621_p6 = pnand %p620_p5, %p614_p2 }
  0x2f   :  { %533 = vmatprep.subr.bf16.mxu0 %v645_v0  ;;  %514 = vmatpush3.bf16.msra.mxu1 %v513_v14  ;;  %v273_v4 = vld [vmem:[#allocation5 + $0xa0] sm:$0xff]  ;;  %v278_v11 = vld [vmem:[#allocation5 + $0xc8] sm:$0xff]  ;;  %v279_v13 = vld [vmem:[#allocation5 + $0xd0] sm:$0xff] }
  0x30   :  { %515 = vmatprep.subr.bf16.mxu1 %v645_v0  ;;  %v534_v6 = vpack.c.bf16 %v274_v5, %v273_v4  ;;  %v277_v10 = vld [vmem:[#allocation5 + $0xc0] sm:$0xff]  ;;  %v280_v14 = vld [vmem:[#allocation5 + $0xd8] sm:$0xff]  ;;  %v283_v19 = vld [vmem:[#allocation5 + $0xf0] sm:$0xff] }
  0x31   :  { %431 = vmatmul.mubr.msk.f32.vlgmr.msra.gmra.mrb[0].mxu0 %vm43_vm1, %v38_v8  ;;  %v276_v8 = vld [vmem:[#allocation5 + $0xb8] sm:$0xff]  ;;  %v540_v12 = vpack.c.bf16 %v278_v11, %v277_v10  ;;  %v543_v15 = vpack.c.bf16 %v280_v14, %v279_v13  ;;  %v281_v16 = vld [vmem:[#allocation5 + $0xe0] sm:$0xff]  ;;  %v287_v25 = vld [vmem:[#allocation5 + $0x110] sm:$0xff] }
  0x32   :  { %500 = vmatprep.mubr.msk.f32.mxu0 %vm646_vm0, %v647_v1  ;;  %535 = vmatpush3.bf16.msra.mxu0 %v534_v6  ;;  %v537_v9 = vpack.c.bf16 %v276_v8, %v275_v7  ;;  %v285_v22 = vld [vmem:[#allocation5 + $0x100] sm:$0xff] }
  0x33   :  { %517 = vmatpush3.bf16.msra.mxu1 %v516_v17  ;;  %536 = vmatprep.subr.bf16.mxu0 %v645_v0  ;;  %v282_v17 = vld [vmem:[#allocation5 + $0xe8] sm:$0xff] }
  0x34   :  { %518 = vmatprep.subr.bf16.mxu1 %v645_v0  ;;  %v546_v18 = vpack.c.bf16 %v282_v17, %v281_v16 }
  0x36   :  { %538 = vmatpush3.bf16.msra.mxu0 %v537_v9 }
  0x37   :  { %520 = vmatpush3.bf16.msra.mxu1 %v519_v20  ;;  %539 = vmatprep.subr.bf16.mxu0 %v645_v0  ;;  %v284_v20 = vld [vmem:[#allocation5 + $0xf8] sm:$0xff] }
  0x38   :  { %521 = vmatprep.subr.bf16.mxu1 %v645_v0  ;;  %v549_v21 = vpack.c.bf16 %v284_v20, %v283_v19 }
  0x3a   :  { %541 = vmatpush3.bf16.msra.mxu0 %v540_v12 }
  0x3b   :  { %523 = vmatpush3.bf16.msra.mxu1 %v522_v23  ;;  %542 = vmatprep.subr.bf16.mxu0 %v645_v0  ;;  %v286_v23 = vld [vmem:[#allocation5 + $0x108] sm:$0xff] }
  0x3c   :  { %524 = vmatprep.subr.bf16.mxu1 %v645_v0  ;;  %v552_v24 = vpack.c.bf16 %v286_v23, %v285_v22 }
  0x3e   :  { %544 = vmatpush3.bf16.msra.mxu0 %v543_v15 }
  0x3f   :  { %526 = vmatpush3.bf16.msra.mxu1 %v525_v26  ;;  %545 = vmatprep.subr.bf16.mxu0 %v645_v0  ;;  %v288_v26 = vld [vmem:[#allocation5 + $0x118] sm:$0xff] }
  0x40   :  { %527 = vmatprep.subr.bf16.mxu1 %v645_v0  ;;  %v555_v27 = vpack.c.bf16 %v288_v26, %v287_v25 }
  0x42   :  { %547 = vmatpush3.bf16.msra.mxu0 %v546_v18 }
  0x43   :  { %529 = vmatpush3.bf16.msra.mxu1 %v528_v29  ;;  %548 = vmatprep.subr.bf16.mxu0 %v645_v0 }
  0x44   :  { %530 = vmatprep.subr.bf16.mxu1 %v645_v0 }
  0x46   :  { %550 = vmatpush3.bf16.msra.mxu0 %v549_v21 }
  0x47   :  { %532 = vmatpush3.bf16.msra.mxu1 %v531_v32  ;;  %551 = vmatprep.subr.bf16.mxu0 %v645_v0 }
  0x4a   :  { %553 = vmatpush3.bf16.msra.mxu0 %v552_v24 }
  0x4b   :  { %554 = vmatprep.subr.bf16.mxu0 %v645_v0 }
  0x4e   :  { %556 = vmatpush3.bf16.msra.mxu0 %v555_v27 }
 0x104   :  { %v113_v33 = vpop.f32.mrb[0].mxu0 }
 0x105   :  { %v117_v34 = vrot.slane %v113_v33, 4  ;;  %v124_v35 = vmul.f32 %v113_v33, %v113_v33  ;;  %v432_v36 = vpop.f32.mrb[1].mxu0 }
 0x107   :  { %v118_v37 = vadd.f32 %v117_v34, %v113_v33  ;;  %v125_v38 = vrot.slane %v124_v35, 4 }
 0x109   :  { %v119_v39 = vrot.slane %v118_v37, 2  ;;  %v126_v40 = vadd.f32 %v125_v38, %v124_v35 }
 0x10b   :  { %v120_v41 = vadd.f32 %v119_v39, %v118_v37  ;;  %v127_v42 = vrot.slane %v126_v40, 2 }
 0x10d   :  { %v121_v43 = vrot.slane %v120_v41, 1  ;;  %v128_v44 = vadd.f32 %v127_v42, %v126_v40 }
 0x10f   :  { %v122_v45 = vadd.f32 %v121_v43, %v120_v41  ;;  %v129_v46 = vrot.slane %v128_v44, 1 }
 0x111   :  { %v123_v47 = vmul.f32 0.125, %v122_v45  ;;  %v130_v48 = vadd.f32 %v129_v46, %v128_v44 }
 0x113   :  { %v131_v49 = vmul.f32 0.125, %v130_v48  ;;  %v132_v50 = vmul.f32 %v123_v47, %v123_v47 }
 0x115   :  { %v133_v51 = vsub.f32 %v131_v49, %v132_v50  ;;  %v256_v50 = vld [vmem:[#allocation5 + $0x123] sm:$0x1] }
 0x117   :  { %v136_v52 = vadd.f32 1e-05, %v133_v51 }
 0x119   :  { %565 = vrsqrt.f32 %v136_v52 }
 0x123   :  { %v566_v57 = vpop.eup %565 }
 0x124   :  { %v138_v58 = vmul.f32 %v566_v57, %v134_v55 }
 0x126   :  { %v144_v60 = vrot.slane %v138_v58, %v710_v56  ;;  %v139_v61 = vmul.f32 %v138_v58, %v123_v47  ;;  %v255_v47 = vld [vmem:[#allocation5 + $0x122] sm:$0x1] }
 0x128   :  { %v140_v62 = vsub.f32 %v135_v59, %v139_v61  ;;  %v145_v63 = vmul.f32 %v144_v60, %v113_v33  ;;  %v382_v59 = vld [vmem:[#allocation5 + $0x124] ss:$0 sm:$0xff] }
 0x12a   :  { %v149_v1 = vrot.slane %v140_v62, %v710_v56 }
 0x12c   :  { %v150_v2 = vadd.f32 %v149_v1, %v145_v63 }
 0x12e   :  { %v151_v3 = vmax.f32 %v150_v2, 0.0 }
 0x130   :  { %466 = vmatmul.mubr.f32.vlgmr.msra.gmra.mrb[0].mxu1 %v151_v3 }
 0x203   :  { %v234_v28 = vpop.f32.mrb[0].mxu1 }
 0x204   :  { %v238_v29 = vrot.slane %v234_v28, 4  ;;  %v245_v30 = vmul.f32 %v234_v28, %v234_v28  ;;  %v467_v31 = vpop.f32.mrb[1].mxu1 }
 0x206   :  { %v239_v32 = vadd.f32 %v238_v29, %v234_v28  ;;  %v246_v33 = vrot.slane %v245_v30, 4 }
 0x208   :  { %v240_v34 = vrot.slane %v239_v32, 2  ;;  %v247_v35 = vadd.f32 %v246_v33, %v245_v30 }
 0x20a   :  { %v241_v36 = vadd.f32 %v240_v34, %v239_v32  ;;  %v248_v37 = vrot.slane %v247_v35, 2 }
 0x20c   :  { %v242_v38 = vrot.slane %v241_v36, 1  ;;  %v249_v39 = vadd.f32 %v248_v37, %v247_v35 }
 0x20e   :  { %v243_v40 = vadd.f32 %v242_v38, %v241_v36  ;;  %v250_v41 = vrot.slane %v249_v39, 1 }
 0x210   :  { %v244_v42 = vmul.f32 0.125, %v243_v40  ;;  %v251_v0 = vadd.f32 %v250_v41, %v249_v39 }
 0x212   :  { %v252_v43 = vmul.f32 0.125, %v251_v0  ;;  %v253_v44 = vmul.f32 %v244_v42, %v244_v42 }
 0x214   :  { %v254_v45 = vsub.f32 %v252_v43, %v253_v44 }
 0x216   :  { %v257_v46 = vadd.f32 1e-05, %v254_v45 }
 0x218   :  { %567 = vrsqrt.f32 %v257_v46 }
 0x222   :  { %v568_v48 = vpop.eup %567 }
 0x223   :  { %v259_v49 = vmul.f32 %v568_v48, %v255_v47 }
 0x225   :  { %v260_v51 = vmul.f32 %v259_v49, %v244_v42  ;;  %v265_v52 = vrot.slane %v259_v49, %v710_v56 }
 0x227   :  { %v261_v53 = vsub.f32 %v256_v50, %v260_v51  ;;  %v266_v54 = vmul.f32 %v265_v52, %v234_v28 }
 0x229   :  { %v270_v55 = vrot.slane %v261_v53, %v710_v56 }
 0x22b   :  { %v271_v57 = vadd.f32 %v270_v55, %v266_v54 }
 0x22d   :  { %v272_v58 = vmax.f32 %v271_v57, 0.0 }
 0x22f   :  { %501 = vmatmul.mubr.f32.vlgmr.msra.gmra.mrb[2].mxu0 %v272_v58 }
 0x302   :  { %v360_v60 = vpop.f32.mrb[2].mxu0 }
 0x303   :  { %v361_v61 = vadd.f32 %v382_v59, %v360_v60  ;;  %v502_v62 = vpop.f32.mrb[3].mxu0 }
 0x305   :  { %364 = vst.msk [vmem:[#allocation7] sm:$0xff] %vm43_vm1, %v361_v61 }
 0x306   :  { %624 = shalt.err (!%p621_p6)
}
 0x307   :  { %s625_s10 = scalar_lea.hbm %s738_s2, 128 }
 0x308   :  { %p626_p7 = scmp.ne.s32.totalorder %s738_s2, %s625_s10  ;;  %p629_p8 = scmp.lt.u32.totalorder %s625_s10, %s738_s2 }
 0x30a   :  { %p631_p9 = pnand %p629_p8, %p626_p7 }
 0x30c   :  { %634 = shalt.err (!%p631_p9)
}
 0x30d   :  { %374 = dma.vmem_to_hbm [thread:$0]  %s372_s6, 128, %s738_s2, [#allocation4]  }
 0x30e   :  { %639 = dma.done.wait [#allocation4], 128  }
 0x30f   :  { %640 = vsyncadd [#allocation4], 4294967168 }
 0x310   :  { %378 = vsyncpa [#allocation3], 1 }
 0x311   :  { %379 = vsyncpa [#allocation6], 1 }
 0x312   :  { %380 = vsyncpa [#allocation4], 1 }

</bundles_post_ra>
